<compile_context>
chip_gen: v6e
topology: v6e:2x2x1
jax: 0.10.0
libtpu: 0.0.40
codegen_flags: <defaults>
</compile_context>

<pallas_src>
import math

import jax
import jax.numpy as jnp
from jax.experimental import pallas as pl
from jax.experimental.pallas import tpu as pltpu

LANE = 128
SUBLANE = 8
MAX_TILE_ROWS = 4096      # 4096 x 128 f32 = 2 MiB per input tile
NCORES = 2                # leading "parallel" axis (v7x has 2 TCs; harmless on 1-TC chips)
PAD_LOGIT = -100.0        # sigmoid(-100) ~ 0 and softplus(-100) ~ 0 in f32


def _round_up(a, b):
    return (a + b - 1) // b * b


def _rowwise_bce_weight(bce_weight, x_shape):
    """Return (rows, 1) per-row weights if the weight is constant inside every
    contiguous 128-element row of the flattened input, else None."""
    bw = jnp.asarray(bce_weight, dtype=jnp.float32)
    bshape = (1,) * (len(x_shape) - bw.ndim) + tuple(bw.shape)
    const_span = 1
    n_trail = 0
    for xs, bs in zip(reversed(x_shape), reversed(bshape)):
        if bs != 1:
            break
        const_span *= xs
        n_trail += 1
    total = math.prod(x_shape)
    if total % LANE != 0 or const_span % LANE != 0:
        return None
    k = len(x_shape) - n_trail
    per_lead = jnp.broadcast_to(bw.reshape(bshape[:k]), x_shape[:k]).reshape(-1)
    return jnp.repeat(per_lead, const_span // LANE).reshape(-1, 1)


def _make_kernel(w_l1, rows_valid, tile_rows, tiles_per_core, needs_mask):
    w_l1 = float(w_l1)

    def kernel(x_ref, t_ref, bw_ref, o_ref):
        @pl.when(pl.program_id(1) == 0)
        def _():
            o_ref[...] = jnp.zeros_like(o_ref)

        x = x_ref[...].astype(jnp.float32)
        t = t_ref[...].astype(jnp.float32)
        bw = bw_ref[...].astype(jnp.float32)       # (tile, 1) or (tile, 128); already * weights

        # Stable BCE-with-logits:  bw * (max(x,0) - x*t + log1p(exp(-|x|)))
        e = jnp.exp(-jnp.abs(x))                   # shared with sigmoid below
        bce = bw * (jnp.maximum(x, 0.0) - x * t + jnp.log1p(e))

        # sigmoid(x) from the same exp:  x>=0 -> 1/(1+e),  x<0 -> e/(1+e)
        recip = 1.0 / (1.0 + e)
        sig = jnp.where(x >= 0.0, recip, e * recip)

        # `weights` is pre-folded into bw, so the per-element mix is just an add.
        mixed = bce + w_l1 * jnp.abs(sig - t)

        if needs_mask:
            # Ragged-tail / duplicated-tile rows contribute exactly 0.
            b = pl.program_id(0) * tiles_per_core + pl.program_id(1)
            r = jax.lax.broadcasted_iota(jnp.int32, (tile_rows, 1), 0)
            valid = (b * tile_rows + r) < rows_valid
            mixed = jnp.where(valid, mixed, 0.0)

        # Sublane-only reduction (pure VPU adds) into the resident output block;
        # the single cross-lane reduction happens once, outside the kernel.
        partial = mixed.reshape(-1, SUBLANE, LANE).sum(axis=0)
        o_ref[...] += partial.reshape(1, SUBLANE, LANE)

    return kernel


def bce_with_mse_loss(x, target, bce_weight, weights: float):
    """x, target: same-shape arrays (e.g. NCHW). bce_weight: broadcastable to x.
    weights: python float mixing coefficient."""
    assert x.shape == target.shape
    x_shape = tuple(x.shape)
    total = int(x.size)
    w_bce = float(weights)
    w_l1 = 1.0 - w_bce

    rows = pl.cdiv(total, LANE)          # valid rows of the (rows, 128) view
    flat_len = rows * LANE

    # Per-row (rows, 1) weight column instead of a full per-element HBM stream;
    # fold the scalar mixing weight in on the host (tiny array, free).
    bw2 = _rowwise_bce_weight(bce_weight, x_shape)
    if bw2 is None:
        # TODO(synk): weight varies inside a 128-lane row; fall back to a full
        # per-element f32 weight stream (+50% HBM read; could be bf16 if the
        # accuracy budget allowed).
        bw_flat = jnp.broadcast_to(jnp.asarray(bce_weight, jnp.float32),
                                   x_shape).reshape(-1)
        if flat_len != total:
            bw_flat = jnp.pad(bw_flat, (0, flat_len - total))   # pad weight 0 -> bce 0
        bw2 = bw_flat.reshape(rows, LANE)
    bw2 = (w_bce * bw2).astype(jnp.float32)

    # Lane-dense (rows, 128) views of x / t. No pad (and no extra HBM pass) in
    # the common case total % 128 == 0.
    if flat_len != total:
        # TODO(synk): lane-ragged input; this pad costs one extra HBM pass.
        x2 = jnp.pad(x.reshape(-1), (0, flat_len - total),
                     constant_values=PAD_LOGIT).reshape(rows, LANE)
        t2 = jnp.pad(target.reshape(-1), (0, flat_len - total)).reshape(rows, LANE)
    else:
        x2 = x.reshape(rows, LANE)
        t2 = target.reshape(rows, LANE)

    # SUBLANE-granularity row pad only if strictly required (<= 7 rows).
    rows_arr = _round_up(rows, SUBLANE)
    if rows_arr != rows:
        pad = rows_arr - rows            # padded rows are masked in-kernel
        x2 = jnp.pad(x2, ((0, pad), (0, 0)))
        t2 = jnp.pad(t2, ((0, pad), (0, 0)))
        bw2 = jnp.pad(bw2, ((0, pad), (0, 0)))

    # Tile sizing: biggest tile that fits, decoupled from the core split.
    tile_rows = min(MAX_TILE_ROWS, rows_arr)
    tiles_total = pl.cdiv(rows_arr, tile_rows)
    ncores = NCORES if tiles_total >= NCORES else 1
    tiles_per_core = pl.cdiv(tiles_total, ncores)
    covered_rows = ncores * tiles_per_core * tile_rows
    needs_mask = covered_rows != rows    # ragged tail / duplicated last tile

    bw_w = bw2.shape[1]

    if ncores * tiles_per_core == tiles_total:
        def row_map(c, t):
            return (c * tiles_per_core + t, 0)
    else:
        def row_map(c, t):
            # Clamp so a duplicated grid point re-reads the last (in-bounds)
            # tile; its contribution is zeroed by the in-kernel row mask.
            return (jnp.minimum(c * tiles_per_core + t, tiles_total - 1), 0)

    bytes_accessed = (x2.size * x2.dtype.itemsize
                      + t2.size * t2.dtype.itemsize
                      + bw2.size * bw2.dtype.itemsize
                      + ncores * SUBLANE * LANE * 4)
    cost = pl.CostEstimate(flops=12 * total, transcendentals=2 * total,
                           bytes_accessed=int(bytes_accessed))

    partials = pl.pallas_call(
        _make_kernel(w_l1, rows, tile_rows, tiles_per_core, needs_mask),
        out_shape=jax.ShapeDtypeStruct((ncores, SUBLANE, LANE), jnp.float32),
        grid=(ncores, tiles_per_core),
        in_specs=[
            pl.BlockSpec((tile_rows, LANE), row_map),
            pl.BlockSpec((tile_rows, LANE), row_map),
            pl.BlockSpec((tile_rows, bw_w), row_map),
        ],
        out_specs=pl.BlockSpec((1, SUBLANE, LANE), lambda c, t: (c, 0, 0)),
        compiler_params=pltpu.CompilerParams(
            # TODO(synk): on v7x verify in xprof that both TCs execute; if not,
            # switch the leading axis to pltpu.CORE_PARALLEL.
            dimension_semantics=("parallel", "arbitrary"),
            vmem_limit_bytes=32 * 1024 * 1024,
        ),
        cost_estimate=cost,
    )(x2, t2, bw2)

    # Single cross-lane reduction of the per-core vector partials + 1/N scale.
    return jnp.sum(partials) * (1.0 / float(total))


def _reference(x, target, bce_weight, weights):
    x = x.astype(jnp.float32)
    t = target.astype(jnp.float32)
    bw = jnp.broadcast_to(bce_weight, x.shape).astype(jnp.float32)
    bce = bw * (jnp.maximum(x, 0.0) - x * t + jnp.log1p(jnp.exp(-jnp.abs(x))))
    entropy_loss = jnp.mean(bce)
    sig = jax.nn.sigmoid(x)
    regression_loss = jnp.mean(jnp.abs(sig - t))
    return weights * entropy_loss + (1.0 - weights) * regression_loss


if __name__ == "__main__":
    key = jax.random.PRNGKey(0)
    k1, k2, k3 = jax.random.split(key, 3)

    B, C, H, W = 2, 4, 16, 16          # NCHW, 2048 elements = 16 rows x 128 lanes
    x = jax.random.normal(k1, (B, C, H, W), dtype=jnp.float32)
    target = jax.random.uniform(k2, (B, C, H, W), dtype=jnp.float32)  # BCE targets in [0, 1]

    # Deterministic "parameters" from the module __init__:
    weights = 0.7                                                     # scalar mixing weight
    bce_weight = jax.random.uniform(k3, (C, 1, 1), dtype=jnp.float32) + 0.5  # per-channel weight

    loss = bce_with_mse_loss(x, target, bce_weight, weights)
    loss = jax.block_until_ready(loss)

    ref = _reference(x, target, bce_weight, weights)
    assert jnp.allclose(loss, ref, rtol=1e-5, atol=1e-5), (loss, ref)

    print("KERNEL_OK")
</pallas_src>

<mosaic_0001>
module attributes {stable_mosaic.version = 11 : i64} {
  func.func @kernel(%arg0: i32, %arg1: i32, %arg2: memref<16x128xf32, #tpu.memory_space<vmem>>, %arg3: memref<16x128xf32, #tpu.memory_space<vmem>>, %arg4: memref<16x1xf32, #tpu.memory_space<vmem>>, %arg5: memref<1x8x128xf32, #tpu.memory_space<vmem>>) attributes {dimension_semantics = [#tpu.dimension_semantics<parallel>, #tpu.dimension_semantics<arbitrary>], iteration_bounds = array<i64: 1, 1>, scalar_prefetch = 0 : i64, scratch_operands = 0 : i64, tpu.core_type = #tpu.core_type<tc>, window_params = [{transform_indices = @transform_0, window_bounds = array<i64: 16, 128>}, {transform_indices = @transform_1, window_bounds = array<i64: 16, 128>}, {transform_indices = @transform_2, window_bounds = array<i64: 16, 1>}, {transform_indices = @transform_3, window_bounds = array<i64: 1, 8, 128>}]} {
    %c0_i32 = arith.constant 0 : i32
    %0 = arith.cmpi eq, %arg1, %c0_i32 : i32
    %1 = arith.extui %0 : i1 to i32
    %c0_i32_0 = arith.constant 0 : i32
    %2 = arith.cmpi ne, %1, %c0_i32_0 : i32
    scf.if %2 {
      %cst_18 = arith.constant 0.000000e+00 : f32
      %37 = vector.broadcast %cst_18 : f32 to vector<1x8x128xf32>
      %c0_19 = arith.constant 0 : index
      %c0_20 = arith.constant 0 : index
      %c0_21 = arith.constant 0 : index
      %38 = vector.load %arg5[%c0_19, %c0_20, %c0_21] : memref<1x8x128xf32, #tpu.memory_space<vmem>>, vector<1x8x128xf32>
      tpu.vector_store %arg5[%c0_19, %c0_20, %c0_21], %37 {strides = array<i32>} : memref<1x8x128xf32, #tpu.memory_space<vmem>>, vector<1x8x128xf32>,
    } else {
    }
    %c0 = arith.constant 0 : index
    %c0_1 = arith.constant 0 : index
    %3 = vector.load %arg2[%c0, %c0_1] : memref<16x128xf32, #tpu.memory_space<vmem>>, vector<16x128xf32>
    %c0_2 = arith.constant 0 : index
    %c0_3 = arith.constant 0 : index
    %4 = vector.load %arg3[%c0_2, %c0_3] : memref<16x128xf32, #tpu.memory_space<vmem>>, vector<16x128xf32>
    %c0_4 = arith.constant 0 : index
    %c0_5 = arith.constant 0 : index
    %5 = vector.load %arg4[%c0_4, %c0_5] : memref<16x1xf32, #tpu.memory_space<vmem>>, vector<16x1xf32>
    %6 = math.absf %3 : vector<16x128xf32>
    %cst = arith.constant 0.000000e+00 : f32
    %7 = vector.broadcast %cst : f32 to vector<16x128xf32>
    %8 = arith.subf %7, %6 : vector<16x128xf32>
    %9 = math.exp %8 : vector<16x128xf32>
    %cst_6 = arith.constant 0.000000e+00 : f32
    %10 = vector.broadcast %cst_6 : f32 to vector<16x128xf32>
    %11 = arith.maximumf %3, %10 : vector<16x128xf32>
    %12 = arith.mulf %3, %4 : vector<16x128xf32>
    %13 = arith.subf %11, %12 : vector<16x128xf32>
    %14 = math.log1p %9 : vector<16x128xf32>
    %15 = arith.addf %13, %14 : vector<16x128xf32>
    %16 = vector.broadcast %5 : vector<16x1xf32> to vector<16x128xf32>
    %17 = arith.mulf %16, %15 : vector<16x128xf32>
    %cst_7 = arith.constant 1.000000e+00 : f32
    %18 = vector.broadcast %cst_7 : f32 to vector<16x128xf32>
    %19 = arith.addf %18, %9 : vector<16x128xf32>
    %cst_8 = arith.constant 1.000000e+00 : f32
    %20 = vector.broadcast %cst_8 : f32 to vector<16x128xf32>
    %21 = arith.divf %20, %19 : vector<16x128xf32>
    %cst_9 = arith.constant 0.000000e+00 : f32
    %22 = vector.broadcast %cst_9 : f32 to vector<16x128xf32>
    %23 = arith.cmpf oge, %3, %22 : vector<16x128xf32>
    %24 = arith.mulf %9, %21 : vector<16x128xf32>
    %25 = arith.select %23, %21, %24 : vector<16x128xi1>, vector<16x128xf32>
    %26 = arith.subf %25, %4 : vector<16x128xf32>
    %27 = math.absf %26 : vector<16x128xf32>
    %cst_10 = arith.constant 3.000000e-01 : f32
    %28 = vector.broadcast %cst_10 : f32 to vector<16x128xf32>
    %29 = arith.mulf %28, %27 : vector<16x128xf32>
    %30 = arith.addf %17, %29 : vector<16x128xf32>
    %31 = vector.shape_cast %30 : vector<16x128xf32> to vector<2x8x128xf32>
    %cst_11 = arith.constant dense<0.000000e+00> : vector<8x128xf32>
    %32 = vector.multi_reduction <add>, %31, %cst_11 [0] : vector<2x8x128xf32> to vector<8x128xf32>
    %c0_12 = arith.constant 0 : index
    %c0_13 = arith.constant 0 : index
    %c0_14 = arith.constant 0 : index
    %33 = vector.load %arg5[%c0_12, %c0_13, %c0_14] : memref<1x8x128xf32, #tpu.memory_space<vmem>>, vector<1x8x128xf32>
    %34 = vector.shape_cast %32 : vector<8x128xf32> to vector<1x8x128xf32>
    %35 = arith.addf %33, %34 : vector<1x8x128xf32>
    %c0_15 = arith.constant 0 : index
    %c0_16 = arith.constant 0 : index
    %c0_17 = arith.constant 0 : index
    %36 = vector.load %arg5[%c0_15, %c0_16, %c0_17] : memref<1x8x128xf32, #tpu.memory_space<vmem>>, vector<1x8x128xf32>
    tpu.vector_store %arg5[%c0_15, %c0_16, %c0_17], %35 {strides = array<i32>} : memref<1x8x128xf32, #tpu.memory_space<vmem>>, vector<1x8x128xf32>,
    return
  }
  func.func @transform_0(%arg0: i32, %arg1: i32) -> (i32, i32) {
    %c1_i32 = arith.constant 1 : i32
    %0 = arith.muli %arg0, %c1_i32 : i32
    %1 = arith.addi %0, %arg1 : i32
    %c0_i32 = arith.constant 0 : i32
    %c0_i32_0 = arith.constant 0 : i32
    return %1, %c0_i32 : i32, i32
  }
  func.func @transform_1(%arg0: i32, %arg1: i32) -> (i32, i32) {
    %c1_i32 = arith.constant 1 : i32
    %0 = arith.muli %arg0, %c1_i32 : i32
    %1 = arith.addi %0, %arg1 : i32
    %c0_i32 = arith.constant 0 : i32
    %c0_i32_0 = arith.constant 0 : i32
    return %1, %c0_i32 : i32, i32
  }
  func.func @transform_2(%arg0: i32, %arg1: i32) -> (i32, i32) {
    %c1_i32 = arith.constant 1 : i32
    %0 = arith.muli %arg0, %c1_i32 : i32
    %1 = arith.addi %0, %arg1 : i32
    %c0_i32 = arith.constant 0 : i32
    %c0_i32_0 = arith.constant 0 : i32
    return %1, %c0_i32 : i32, i32
  }
  func.func @transform_3(%arg0: i32, %arg1: i32) -> (i32, i32, i32) {
    %c0_i32 = arith.constant 0 : i32
    %c0_i32_0 = arith.constant 0 : i32
    %c0_i32_1 = arith.constant 0 : i32
    return %arg0, %c0_i32, %c0_i32_0 : i32, i32, i32
  }
}

</mosaic_0001>

<bundles_post_ra>
// kernel: tpu_custom_call.1
= control target key start
LH: loop header
LB: loop body
LE: loop exit
PB: predicated region body
PF: predicated region fallthrough
CT: control target
= control target key end

     0   :  { %8 = vsyncpa [#allocation3], 0  ;;  %s293_s0 = inlined_call_operand.vmem [shape: f32[16,128], index: 0, kind: input, shape index: {}]   ;;  %s294_s1 = inlined_call_operand.hbm [shape: f32[16,128], index: 1, kind: input, shape index: {}]   ;;  %s295_s2 = inlined_call_operand.vmem [shape: f32[16,1], index: 2, kind: input, shape index: {}]   ;;  %s296_s3 = inlined_call_operand.hbm [shape: f32[1,8,128], index: 3, kind: output, shape index: {}]  }
   0x1   :  { %9 = vsyncpa [#allocation4], 0  ;;  %s250_s12 = smov [#allocation2]  }
   0x2   :  { %s29_s13 = sshll.u32 %s250_s12, 4  ;;  %s30_s13 = int_to_ptr.vmem [resolvable:$true] %s29_s13 }
   0x3   :  { %s214_s14 = scalar_lea.vmem %s30_s13, 256  ;;  %p219_p1 = scmp.lt.s32.totalorder %s30_s13, %s30_s13 }
   0x4   :  { %p215_p0 = scmp.ne.s32.totalorder %s30_s13, %s214_s14  ;;  %p220_p2 = scmp.lt.s32.totalorder %s214_s14, %s214_s14 }
   0x6   :  { %p221_p3 = por %p220_p2, %p219_p1 }
   0x8   :  { %p222_p4 = pnand %p221_p3, %p215_p0 }
   0xa   :  { %225 = shalt.err (!%p222_p4)
}
   0xb   :  { %s251_s15 = smov 128   ;;  %s252_s16 = smov 8  }
   0xc   :  { %35 = dma.hbm_to_vmem [thread:$0]  %s294_s1, 256, %s30_s13, [#allocation3], %s251_s15, %s251_s15, %s252_s16  }
   0xd   :  { %246 = dma.done.wait [#allocation3], 256  }
   0xe   :  { %247 = vsyncadd [#allocation3], 4294967040  ;;  %v253_v0 = vmov 0   ;;  %v88_v1 = vld [vmem:[%s295_s2] sm:$0xff]  ;;  %v89_v2 = vld [vmem:[%s295_s2 + $0x8] sm:$0xff] }
   0xf   :  { %193 = vset.pattern.permute.xlu0 %v253_v0  ;;  %v84_v3 = vld [vmem:[%s293_s0] sm:$0xff]  ;;  %v85_v4 = vld [vmem:[%s293_s0 + $0x8] sm:$0xff]  ;;  %s254_s0 = smov [#allocation5]  }
  0x10   :  { %126 = vperm.xlu0 %193, %v88_v1   ;;  %v90_v5 = vand.u32 2147483647, %v84_v3  ;;  %v91_v6 = vand.u32 2147483647, %v85_v4  ;;  %v86_v19 = vld [vmem:[#allocation2] sm:$0xff]  ;;  %vm142_vm0 = vcmp.ge.f32.partialorder %v84_v3, 0.0 }
  0x11   :  { %vm143_vm1 = vcmp.ge.f32.partialorder %v85_v4, 0.0  ;;  %v87_v25 = vld [vmem:[#allocation2 + $0x8] sm:$0xff]  ;;  %v98_v28 = vmax.f32 %v84_v3, 0.0  ;;  %v100_v29 = vmul.f32 %v86_v19, %v84_v3  ;;  %v99_v35 = vmax.f32 %v85_v4, 0.0  ;;  %s166_s2 = sshll.u32 %s254_s0, 4  ;;  %s167_s2 = int_to_ptr.vmem [resolvable:$true] %s166_s2 }
  0x12   :  { %v92_v7 = vsub.f32 0.0, %v90_v5  ;;  %v93_v8 = vsub.f32 0.0, %v91_v6  ;;  %v101_v36 = vmul.f32 %v87_v25, %v85_v4  ;;  %s226_s26 = scalar_lea.vmem %s167_s2, 128  ;;  %p231_p6 = scmp.lt.s32.totalorder %s167_s2, %s167_s2 }
  0x13   :  { %v102_v39 = vsub.f32 %v98_v28, %v100_v29  ;;  %p227_p5 = scmp.ne.s32.totalorder %s167_s2, %s226_s26  ;;  %p232_p7 = scmp.lt.s32.totalorder %s226_s26, %s226_s26 }
  0x14   :  { %131 = vperm.xlu0 %193, %v89_v2   ;;  %v94_v9 = vmul.f32 1.442695, %v92_v7  ;;  %v96_v10 = vmul.f32 1.442695, %v93_v8  ;;  %v103_v43 = vsub.f32 %v99_v35, %v101_v36 }
  0x15   :  { %p233_p8 = por %p232_p7, %p231_p6 }
  0x16   :  { %194 = vpow2.f32 %v94_v9 }
  0x17   :  { %196 = vpow2.f32 %v96_v10  ;;  %p234_p9 = pnand %p233_p8, %p227_p5 }
  0x23   :  { %v195_v11 = vpop.eup %194 }
  0x24   :  { %v197_v12 = vpop.eup %196  ;;  %v104_v13 = vadd.f32 1.0, %v195_v11  ;;  %v107_v16 = vmul.f32 -0.5, %v195_v11  ;;  %v110_v24 = vand.u32 2147483647, %v195_v11 }
  0x25   :  { %v113_v14 = vadd.f32 1.0, %v197_v12  ;;  %v116_v18 = vmul.f32 -0.5, %v197_v12  ;;  %v119_v30 = vand.u32 2147483647, %v197_v12 }
  0x26   :  { %198 = vrcp.f32 %v104_v13  ;;  %v108_v20 = vadd.f32 1.0, %v107_v16  ;;  %vm111_vm2 = vcmp.lt.f32.partialorder %v110_v24, 0.0004427343 }
  0x27   :  { %200 = vrcp.f32 %v113_v14  ;;  %v117_v26 = vadd.f32 1.0, %v116_v18  ;;  %vm120_vm3 = vcmp.lt.f32.partialorder %v119_v30, 0.0004427343 }
  0x28   :  { %202 = vlog2.f32 %v104_v13  ;;  %v109_v32 = vmul.f32 %v195_v11, %v108_v20 }
  0x29   :  { %204 = vlog2.f32 %v113_v14  ;;  %v118_v38 = vmul.f32 %v197_v12, %v117_v26 }
  0x33   :  { %v199_v15 = vpop.eup %198 }
  0x34   :  { %v201_v17 = vpop.eup %200  ;;  %v144_v21 = vmul.f32 %v199_v15, %v195_v11 }
  0x35   :  { %v145_v22 = vmul.f32 %v201_v17, %v197_v12  ;;  %v203_v23 = vpop.eup %202 }
  0x36   :  { %v205_v27 = vpop.eup %204  ;;  %v106_v31 = vmul.f32 0.6931472, %v203_v23  ;;  %v146_v33 = vsel %vm142_vm0, %v199_v15, %v144_v21 }
  0x37   :  { %v147_v34 = vsel %vm143_vm1, %v201_v17, %v145_v22  ;;  %v115_v37 = vmul.f32 0.6931472, %v205_v27  ;;  %v148_v40 = vsub.f32 %v146_v33, %v86_v19 }
  0x38   :  { %v149_v41 = vsub.f32 %v147_v34, %v87_v25  ;;  %v112_v42 = vsel %vm111_vm2, %v109_v32, %v106_v31 }
  0x39   :  { %v121_v44 = vsel %vm120_vm3, %v118_v38, %v115_v37  ;;  %v122_v45 = vadd.f32 %v112_v42, %v102_v39  ;;  %v150_v46 = vand.u32 2147483647, %v148_v40 }
  0x3a   :  { %v151_v47 = vand.u32 2147483647, %v149_v41  ;;  %v123_v49 = vadd.f32 %v121_v44, %v103_v43 }
  0x3b   :  { %v152_v51 = vmul.f32 0.3, %v150_v46 }
  0x3c   :  { %v153_v52 = vmul.f32 0.3, %v151_v47 }
  0x8b   :  { %v127_v48 = vpop.permute.xlu0 %126 }
  0x8c   :  { %v134_v50 = vmul.f32 %v127_v48, %v122_v45 }
  0x8e   :  { %v154_v55 = vadd.f32 %v152_v51, %v134_v50 }
  0x8f   :  { %v132_v53 = vpop.permute.xlu0 %131 }
  0x90   :  { %v135_v54 = vmul.f32 %v132_v53, %v123_v49 }
  0x92   :  { %v155_v56 = vadd.f32 %v153_v52, %v135_v54 }
  0x94   :  { %v156_v57 = vadd.f32 %v155_v56, %v154_v55 }
  0x96   :  { %159 = vst [vmem:[#allocation5] sm:$0xff] %v156_v57 }
  0x97   :  { %237 = shalt.err (!%p234_p9)
}
  0x98   :  { %169 = dma.vmem_to_hbm [thread:$0]  %s167_s2, 128, %s296_s3, [#allocation4]  }
  0x99   :  { %248 = dma.done.wait [#allocation4], 128  }
  0x9a   :  { %249 = vsyncadd [#allocation4], 4294967168 }
  0x9b   :  { %173 = vsyncpa [#allocation3], 1 }
  0x9c   :  { %174 = vsyncpa [#allocation4], 1 }

</bundles_post_ra>
